<compile_context>
chip_gen: v7x
topology: tpu7x:2x2x1
jax: 0.10.0
libtpu: 0.0.40
codegen_flags: <defaults>
</compile_context>

<pallas_src>
import numpy as np
import jax
import jax.numpy as jnp
from jax.experimental import pallas as pl
from jax.experimental.pallas import tpu as pltpu


def _product_regr_kernel(zp_ref, w_ref, logb_ref, o_ref):
    # zp: (tb, 8*D) lane-dense packed rows; w: (8*D, 8*y) block-diagonal;
    # o[n, r*y + j] = exp( sum_k log|zp[n,k]| * w[k, r*y+j] + log(bias[j]) )
    logz = jnp.log(jnp.abs(zp_ref[...]))                                   # EUP, full vregs
    s = jnp.dot(logz, w_ref[...], preferred_element_type=jnp.float32)      # MXU, K = 8*D
    o_ref[...] = jnp.exp(s + logb_ref[...]).astype(o_ref.dtype)            # EUP + VPU


def product_regr_pallas(z, out_weights, out_bias, *, block_rows: int = 32768):
    """z: (B, latent_dim); out_weights: (latent_dim, y_dim); out_bias: (y_dim,)."""
    B, D = z.shape
    y_dim = out_weights.shape[1]
    pack = 8  # sublane packing factor: 8 original rows per packed row

    z = z.astype(jnp.float32)
    w = out_weights.astype(jnp.float32)
    logb = jnp.log(out_bias.astype(jnp.float32))

    # Tiny tail pad only (to a multiple of 8 rows) so the lane-dense reshape works.
    # Pad value 1.0 -> log(1)=0, padded rows stay finite; sliced off at the end.
    B8 = ((B + pack - 1) // pack) * pack
    if B8 != B:
        z = jnp.pad(z, ((0, B8 - B), (0, 0)), constant_values=1.0)
    n_packed = B8 // pack

    # Lane-dense repack: rows are contiguous, so this reshape is free.
    zp = z.reshape(n_packed, pack * D)

    # Block-diagonal weight expansion: W_exp[r*D + l, r*y_dim + j] = W[l, j].
    eye = jnp.eye(pack, dtype=jnp.float32)
    w_exp = jnp.einsum("rs,lj->rlsj", eye, w).reshape(pack * D, pack * y_dim)
    # log(bias) tiled per packed slot: logb_exp[r*y_dim + j] = log(bias[j]).
    logb_exp = jnp.tile(logb, (pack,)).reshape(1, pack * y_dim)

    # Packed-row tile: ~block_rows original rows per step (>=1 MiB of z),
    # rounded to a multiple of 8 sublanes; single full block for small inputs.
    tbp = block_rows // pack
    if n_packed <= tbp:
        tbp = n_packed
        n_blocks = 1
    else:
        tbp = ((tbp + pack - 1) // pack) * pack
        n_blocks = pl.cdiv(n_packed, tbp)   # partial last block, no full-array pad

    out = pl.pallas_call(
        _product_regr_kernel,
        out_shape=jax.ShapeDtypeStruct((n_packed, pack * y_dim), jnp.float32),
        grid=(n_blocks,),
        in_specs=[
            pl.BlockSpec((tbp, pack * D), lambda i: (i, 0)),          # z: tiled (pipelined)
            pl.BlockSpec((pack * D, pack * y_dim), lambda i: (0, 0)),  # W_exp: VMEM-resident
            pl.BlockSpec((1, pack * y_dim), lambda i: (0, 0)),         # log bias: VMEM-resident
        ],
        out_specs=pl.BlockSpec((tbp, pack * y_dim), lambda i: (i, 0)),
        compiler_params=pltpu.CompilerParams(
            dimension_semantics=("parallel",),     # shard batch tiles across v7x's 2 TCs
            vmem_limit_bytes=48 * 1024 * 1024,     # <= v7x 64 MiB physical; plenty of headroom
        ),
    )(zp, w_exp, logb_exp)

    # Unpack (n_packed, 8*y_dim) -> (B8, y_dim); slice off the tail pad.
    return out.reshape(B8, y_dim)[:B]


def product_regr_ref(z, out_weights, out_bias):
    """Pure-JAX reference matching the PyTorch forward literally."""
    za = jnp.abs(z)
    powered = za[:, :, None] ** out_weights[None, :, :]
    prod = jnp.prod(powered, axis=1)
    return out_bias * prod


if __name__ == "__main__":
    latent_dim = 16
    y_dim = 2
    batch = 8

    key = jax.random.PRNGKey(0)
    kz, kw, kb = jax.random.split(key, 3)
    z = jax.random.normal(kz, (batch, latent_dim), jnp.float32)
    out_weights = jax.random.uniform(kw, (latent_dim, y_dim), jnp.float32)  # ~ torch.rand
    out_bias = jax.random.uniform(kb, (y_dim,), jnp.float32)                # ~ torch.rand

    out = product_regr_pallas(z, out_weights, out_bias)
    out = jax.block_until_ready(out)

    ref = product_regr_ref(z, out_weights, out_bias)
    np.testing.assert_allclose(np.asarray(out), np.asarray(ref), rtol=1e-3, atol=1e-6)

    print("KERNEL_OK")
</pallas_src>

<mosaic_0001>
module attributes {stable_mosaic.version = 11 : i64} {
  func.func @_product_regr_kernel(%arg0: i32, %arg1: memref<1x128xf32, #tpu.memory_space<vmem>>, %arg2: memref<128x16xf32, #tpu.memory_space<vmem>>, %arg3: memref<1x16xf32, #tpu.memory_space<vmem>>, %arg4: memref<1x16xf32, #tpu.memory_space<vmem>>) attributes {dimension_semantics = [#tpu.dimension_semantics<parallel>], iteration_bounds = array<i64: 1>, scalar_prefetch = 0 : i64, scratch_operands = 0 : i64, tpu.core_type = #tpu.core_type<tc>, window_params = [{transform_indices = @transform_0, window_bounds = array<i64: 1, 128>}, {pipeline_mode = #tpu.pipeline_mode<synchronous>, transform_indices = @transform_1, window_bounds = array<i64: 128, 16>}, {pipeline_mode = #tpu.pipeline_mode<synchronous>, transform_indices = @transform_2, window_bounds = array<i64: 1, 16>}, {transform_indices = @transform_3, window_bounds = array<i64: 1, 16>}]} {
    %c0 = arith.constant 0 : index
    %c0_0 = arith.constant 0 : index
    %0 = vector.load %arg1[%c0, %c0_0] : memref<1x128xf32, #tpu.memory_space<vmem>>, vector<1x128xf32>
    %1 = math.absf %0 : vector<1x128xf32>
    %2 = math.log %1 : vector<1x128xf32>
    %c0_1 = arith.constant 0 : index
    %c0_2 = arith.constant 0 : index
    %3 = vector.load %arg2[%c0_1, %c0_2] : memref<128x16xf32, #tpu.memory_space<vmem>>, vector<128x16xf32>
    %cst = arith.constant dense<0.000000e+00> : vector<1x16xf32>
    %4 = tpu.matmul %2, %3, %cst {dimension_numbers = #tpu.dot_dimension_numbers<[1], [0], [0], [1], [0, 0, 1, 1], [], []>} : vector<1x128xf32>, vector<128x16xf32>, vector<1x16xf32> -> vector<1x16xf32>
    %c0_3 = arith.constant 0 : index
    %c0_4 = arith.constant 0 : index
    %5 = vector.load %arg3[%c0_3, %c0_4] : memref<1x16xf32, #tpu.memory_space<vmem>>, vector<1x16xf32>
    %6 = arith.addf %4, %5 : vector<1x16xf32>
    %7 = math.exp %6 : vector<1x16xf32>
    %c0_5 = arith.constant 0 : index
    %c0_6 = arith.constant 0 : index
    %8 = vector.load %arg4[%c0_5, %c0_6] : memref<1x16xf32, #tpu.memory_space<vmem>>, vector<1x16xf32>
    tpu.vector_store %arg4[%c0_5, %c0_6], %7 {strides = array<i32>} : memref<1x16xf32, #tpu.memory_space<vmem>>, vector<1x16xf32>,
    return
  }
  func.func @transform_0(%arg0: i32) -> (i32, i32) {
    %c0_i32 = arith.constant 0 : i32
    %c0_i32_0 = arith.constant 0 : i32
    return %arg0, %c0_i32 : i32, i32
  }
  func.func @transform_1(%arg0: i32) -> (i32, i32) {
    %c0_i32 = arith.constant 0 : i32
    %c0_i32_0 = arith.constant 0 : i32
    %c0_i32_1 = arith.constant 0 : i32
    return %c0_i32, %c0_i32_0 : i32, i32
  }
  func.func @transform_2(%arg0: i32) -> (i32, i32) {
    %c0_i32 = arith.constant 0 : i32
    %c0_i32_0 = arith.constant 0 : i32
    %c0_i32_1 = arith.constant 0 : i32
    return %c0_i32, %c0_i32_0 : i32, i32
  }
  func.func @transform_3(%arg0: i32) -> (i32, i32) {
    %c0_i32 = arith.constant 0 : i32
    %c0_i32_0 = arith.constant 0 : i32
    return %arg0, %c0_i32 : i32, i32
  }
}

</mosaic_0001>

<bundles_post_ra>
// kernel: tpu_custom_call.1
= control target key start
LH: loop header
LB: loop body
LE: loop exit
PB: predicated region body
PF: predicated region fallthrough
CT: control target
= control target key end

     0   :  { %v232_v3 = vmov 0.0|0.0   ;;  %vm233_vm0 = vmmov 0   ;;  %v234_v6 = vmov 0.0   ;;  %s322_s0 = inlined_call_operand.vmem [shape: f32[1,128], index: 0, kind: input, shape index: {}]   ;;  %s323_s1 = inlined_call_operand.vmem [shape: f32[128,16], index: 1, kind: input, shape index: {}]   ;;  %s324_s2 = inlined_call_operand.vmem [shape: f32[1,16], index: 2, kind: input, shape index: {}]   ;;  %s325_s3 = inlined_call_operand.hbm [shape: f32[1,16], index: 3, kind: output, shape index: {}]  }
   0x1   :  { %v19_v0 = vld [vmem:[%s323_s1] sm:$0xff]  ;;  %v20_v1 = vld [vmem:[%s323_s1 + $0x8] sm:$0xff]  ;;  %v21_v2 = vld [vmem:[%s323_s1 + $0x10] sm:$0xff]  ;;  %176 = vmatprep.subr.bf16.mxu0 %v232_v3  ;;  %173 = vmatprep.mubr.msk.f32.mxu0 %vm233_vm0, %v234_v6 }
   0x2   :  { %v177_v4 = vpack.c.bf16 %v20_v1, %v19_v0  ;;  %v22_v5 = vld [vmem:[%s323_s1 + $0x18] sm:$0xff]  ;;  %v23_v8 = vld [vmem:[%s323_s1 + $0x20] sm:$0xff]  ;;  %v24_v9 = vld [vmem:[%s323_s1 + $0x28] sm:$0xff] }
   0x3   :  { %v180_v7 = vpack.c.bf16 %v22_v5, %v21_v2 }
   0x4   :  { %178 = vmatpush3.bf16.msra.mxu0 %v177_v4 }
   0x5   :  { %179 = vmatprep.subr.bf16.mxu0 %v232_v3 }
   0x6   :  { %8 = vsyncpa [#allocation3], 0  ;;  %v183_v10 = vpack.c.bf16 %v24_v9, %v23_v8  ;;  %v25_v11 = vld [vmem:[%s323_s1 + $0x30] sm:$0xff]  ;;  %v26_v12 = vld [vmem:[%s323_s1 + $0x38] sm:$0xff]  ;;  %s235_s20 = smov [#allocation2]   ;;  %vm108_vm1 = vcmask 122880  }
   0x7   :  { %v15_v13 = vld [vmem:[%s322_s0] sm:$0x1]  ;;  %v186_v14 = vpack.c.bf16 %v26_v12, %v25_v11  ;;  %v28_v16 = vld [vmem:[%s323_s1 + $0x48] sm:$0xff]  ;;  %v29_v19 = vld [vmem:[%s323_s1 + $0x50] sm:$0xff]  ;;  %s116_s21 = sshll.u32 %s235_s20, 4  ;;  %s117_s21 = int_to_ptr.vmem [resolvable:$true] %s116_s21 }
   0x8   :  { %181 = vmatpush3.bf16.msra.mxu0 %v180_v7  ;;  %v27_v15 = vld [vmem:[%s323_s1 + $0x40] sm:$0xff]  ;;  %v16_v17 = vand.u32 2147483647, %v15_v13  ;;  %v30_v20 = vld [vmem:[%s323_s1 + $0x58] sm:$0xff]  ;;  %v32_v23 = vld [vmem:[%s323_s1 + $0x68] sm:$0xff]  ;;  %s212_s22 = scalar_lea.vmem %s117_s21, 32  ;;  %p213_p1 = scmp.lt.s32.totalorder %s117_s21, %s117_s21 }
   0x9   :  { %182 = vmatprep.subr.bf16.mxu0 %v232_v3  ;;  %v189_v18 = vpack.c.bf16 %v28_v16, %v27_v15  ;;  %v192_v21 = vpack.c.bf16 %v30_v20, %v29_v19  ;;  %v31_v22 = vld [vmem:[%s323_s1 + $0x60] sm:$0xff]  ;;  %v33_v25 = vld [vmem:[%s323_s1 + $0x70] sm:$0xff]  ;;  %v34_v26 = vld [vmem:[%s323_s1 + $0x78] sm:$0xff]  ;;  %s208_s1 = scalar_lea.vmem %s117_s21, 16 }
   0xa   :  { %204 = vlog2.f32 %v16_v17  ;;  %v195_v24 = vpack.c.bf16 %v32_v23, %v31_v22  ;;  %v198_v28 = vpack.c.bf16 %v34_v26, %v33_v25  ;;  %v35_v30 = vld [vmem:[%s324_s2] sm:$0x1]  ;;  %p209_p0 = scmp.ne.s32.totalorder %s117_s21, %s208_s1  ;;  %p214_p2 = scmp.lt.s32.totalorder %s212_s22, %s208_s1 }
   0xc   :  { %184 = vmatpush3.bf16.msra.mxu0 %v183_v10  ;;  %p215_p3 = por %p214_p2, %p213_p1 }
   0xd   :  { %185 = vmatprep.subr.bf16.mxu0 %v232_v3 }
   0xe   :  { %p216_p4 = pnand %p215_p3, %p209_p0 }
  0x10   :  { %187 = vmatpush3.bf16.msra.mxu0 %v186_v14 }
  0x11   :  { %188 = vmatprep.subr.bf16.mxu0 %v232_v3 }
  0x14   :  { %190 = vmatpush3.bf16.msra.mxu0 %v189_v18  ;;  %v205_v27 = vpop.eup %204 }
  0x15   :  { %191 = vmatprep.subr.bf16.mxu0 %v232_v3  ;;  %v18_v29 = vmul.f32 0.6931472, %v205_v27 }
  0x18   :  { %193 = vmatpush3.bf16.msra.mxu0 %v192_v21 }
  0x19   :  { %194 = vmatprep.subr.bf16.mxu0 %v232_v3 }
  0x1c   :  { %196 = vmatpush3.bf16.msra.mxu0 %v195_v24 }
  0x1d   :  { %197 = vmatprep.subr.bf16.mxu0 %v232_v3 }
  0x20   :  { %199 = vmatpush3.bf16.msra.mxu0 %v198_v28 }
  0x23   :  { %174 = vmatmul.mubr.f32.vlgmr.msra.gmra.mrb[0].mxu0 %v18_v29 }
  0xf6   :  { %v102_v31 = vpop.f32.mrb[0].mxu0 }
  0xf7   :  { %v103_v32 = vadd.f32 %v102_v31, %v35_v30  ;;  %v175_v33 = vpop.f32.mrb[1].mxu0 }
  0xf9   :  { %v106_v34 = vmul.f32 1.442695, %v103_v32 }
  0xfb   :  { %206 = vpow2.f32 %v106_v34 }
 0x105   :  { %v207_v35 = vpop.eup %206 }
 0x106   :  { %109 = vst.msk [vmem:[#allocation2] sm:$0x1] %vm108_vm1, %v207_v35 }
 0x107   :  { %219 = shalt.err (!%p216_p4)
}
 0x108   :  { %s220_s24 = scalar_lea.hbm %s325_s3, 16 }
 0x109   :  { %p221_p5 = scmp.ne.s32.totalorder %s325_s3, %s220_s24  ;;  %p224_p6 = scmp.lt.u32.totalorder %s220_s24, %s325_s3 }
 0x10b   :  { %p226_p7 = pnand %p224_p6, %p221_p5 }
 0x10d   :  { %229 = shalt.err (!%p226_p7)
}
 0x10e   :  { %119 = dma.vmem_to_hbm [thread:$0]  %s117_s21, 16, %s325_s3, [#allocation3]  }
 0x10f   :  { %230 = dma.done.wait [#allocation3], 16  }
 0x110   :  { %231 = vsyncadd [#allocation3], 4294967280 }
 0x111   :  { %123 = vsyncpa [#allocation3], 1 }

</bundles_post_ra>
